<compile_context>
chip_gen: v5e
topology: v5e:2x2
jax: 0.10.0
libtpu: 0.0.40
codegen_flags: <defaults>
</compile_context>

<pallas_src>
import jax
import jax.numpy as jnp
import numpy as np
from jax import lax
from jax.experimental import pallas as pl
from jax.experimental.pallas import tpu as pltpu

H = W = 28                          # spatial size implied by fc = Linear(32*14*14, 10)
KH = KW = 3
TAPS = KH * KW                      # 9
C_OUT = 32
POOL = 2
NCAND = POOL * POOL                 # 4 pool candidates per pooled pixel
HP, WP = H // POOL, W // POOL       # 14, 14
NPIX = HP * WP                      # 196 pooled pixels per image
NGRP = NPIX // NCAND                # 49 groups of 4 consecutive pooled pixels
GK = NCAND * TAPS                   # 36 patch columns per group row
LANES = NCAND * C_OUT               # 128 output lanes per group row (lane-dense)
FC_IN = C_OUT * HP * WP             # 6272
FC_OUT = 10


# ---------------- Pallas kernels ----------------

def _conv_pool_kernel(p_ref, w_ref, b_ref, o_ref):
    """Fused conv(3x3, cin=1) + bias + ReLU + 2x2 max-pool.

    p_ref: (4, TB, 49, 36)  im2col patches, one slab per pool-candidate (hp,wp).
                            Row g packs 4 consecutive pooled pixels p = 4g+q,
                            column = q*9 + tap.
    w_ref: (36, 128)        block-diagonal conv weight: w[q*9+t, q*32+c] = Wc[t, c].
    b_ref: (1, 128)         conv bias tiled 4x along lanes.
    o_ref: (TB, 49, 128)    pooled features; lane = q*32 + c, so row-major flatten of
                            o is exactly the NHWC-flattened feature vector (p*32 + c).
    """
    w = w_ref[...]
    b = b_ref[...]
    for q in range(o_ref.shape[0]):          # static unroll over images in the tile
        s0 = jnp.dot(p_ref[0, q], w, preferred_element_type=jnp.float32)
        s1 = jnp.dot(p_ref[1, q], w, preferred_element_type=jnp.float32)
        s2 = jnp.dot(p_ref[2, q], w, preferred_element_type=jnp.float32)
        s3 = jnp.dot(p_ref[3, q], w, preferred_element_type=jnp.float32)
        m = jnp.maximum(jnp.maximum(s0, s1), jnp.maximum(s2, s3))
        # relu(max(.) + b) == maxpool(relu(conv)) since bias is shared and relu is monotone
        o_ref[q] = jnp.maximum(m + b, 0.0)


def _fc_kernel(x_ref, w_ref, b_ref, o_ref):
    # x_ref: (TBF, 6272); w_ref: (10, 6272) lane-dense; b_ref: (1, 10); o_ref: (TBF, 10)
    o_ref[...] = lax.dot_general(
        x_ref[...], w_ref[...],
        dimension_numbers=(((1,), (1,)), ((), ())),     # NT: contract both last dims
        preferred_element_type=jnp.float32,
    ) + b_ref[...]


# ---------------- wrappers ----------------

def _pick_batch_tile(batch):
    # Largest tile that divides batch while keeping >= 2 grid steps (v7x: 2 TensorCores).
    for d in (8, 4, 2, 1):
        if batch % d == 0 and batch // d >= 2:
            return d
    return 1


def conv_pool_pallas(patches, w_bd, b_bd):
    _, B, G, K = patches.shape
    tb = _pick_batch_tile(B)
    return pl.pallas_call(
        _conv_pool_kernel,
        out_shape=jax.ShapeDtypeStruct((B, G, LANES), jnp.float32),
        grid=(B // tb,),
        in_specs=[
            pl.BlockSpec((NCAND, tb, G, K), lambda i: (0, i, 0, 0)),
            pl.BlockSpec((K, LANES), lambda i: (0, 0)),
            pl.BlockSpec((1, LANES), lambda i: (0, 0)),
        ],
        out_specs=pl.BlockSpec((tb, G, LANES), lambda i: (i, 0, 0)),
        compiler_params=pltpu.CompilerParams(dimension_semantics=("parallel",)),
    )(patches, w_bd, b_bd)


def fc_pallas(feat, w_fc, b_fc):
    B = feat.shape[0]
    # Block the batch axis when it tiles cleanly; otherwise fall back to the full batch
    # (keeps BlockSpec dims equal to full array dims -> always tile-legal).
    tbf = 8 if (B % 8 == 0) else B
    return pl.pallas_call(
        _fc_kernel,
        out_shape=jax.ShapeDtypeStruct((B, FC_OUT), jnp.float32),
        grid=(B // tbf,),
        in_specs=[
            pl.BlockSpec((tbf, FC_IN), lambda i: (i, 0)),
            pl.BlockSpec((FC_OUT, FC_IN), lambda i: (0, 0)),
            pl.BlockSpec((1, FC_OUT), lambda i: (0, 0)),
        ],
        out_specs=pl.BlockSpec((tbf, FC_OUT), lambda i: (i, 0)),
        compiler_params=pltpu.CompilerParams(dimension_semantics=("parallel",)),
    )(feat, w_fc, b_fc)


def _pool_grouped_patches(x_nchw):
    """(B,1,28,28) -> (4, B, 49, 36) im2col patches grouped by pool candidate.

    patches[hp*2+wp, b, g, q*9 + kh*3+kw] = xpad[b, 2i+hp+kh, 2j+wp+kw]
    where pooled pixel p = 4g+q = i*14+j and xpad is the zero-padded image (padding=1).
    Pure XLA slicing/stack glue on the tiny input; fuses into one small copy.
    """
    B = x_nchw.shape[0]
    x2d = x_nchw[:, 0, :, :]                               # (B, 28, 28), cin == 1
    xp = jnp.pad(x2d, ((0, 0), (1, 3), (1, 3)))            # (B, 32, 32); extra zeros unused
    cands = []
    for hp in range(POOL):
        for wp in range(POOL):
            taps = [xp[:, hp + kh: hp + kh + H: POOL, wp + kw: wp + kw + W: POOL]
                    for kh in range(KH) for kw in range(KW)]     # 9 x (B, 14, 14)
            cands.append(jnp.stack(taps, axis=-1))               # (B, 14, 14, 9)
    patches = jnp.stack(cands, axis=0)                           # (4, B, 14, 14, 9)
    return patches.reshape(NCAND, B, NGRP, GK)                   # (4, B, 49, 36)


@jax.jit
def simple_cnn_forward(x_nchw, prepared):
    w_bd, b_bd, w_fc, b_fc = prepared
    B = x_nchw.shape[0]
    patches = _pool_grouped_patches(x_nchw)
    feat = conv_pool_pallas(patches, w_bd, b_bd)           # (B, 49, 128) lane-dense
    feat = feat.reshape(B, FC_IN)                          # free: already NHWC flatten order
    return fc_pallas(feat, w_fc, b_fc)                     # (B, 10)


# ---------------- parameters ----------------

def init_params(key):
    k1, k2, k3, k4 = jax.random.split(key, 4)
    # conv weight as (kh*kw, c_out) for the im2col matmul (cin == 1); equivalent to
    # PyTorch's (32,1,3,3) up to a deterministic re-layout.
    w_conv = jax.random.normal(k1, (TAPS, C_OUT), jnp.float32) * 0.1
    b_conv = jax.random.normal(k2, (1, C_OUT), jnp.float32) * 0.1
    # fc weight stored (out, in) with the `in` axis in NHWC flatten order
    # ((h*14+w)*32 + c); equivalent to PyTorch's (10, 6272) weight up to a fixed,
    # one-time column permutation folded into the parameter (no runtime transpose).
    w_fc = jax.random.normal(k3, (FC_OUT, FC_IN), jnp.float32) * 0.01
    b_fc = jax.random.normal(k4, (1, FC_OUT), jnp.float32) * 0.01
    return w_conv, b_conv, w_fc, b_fc


def prepare_params(params):
    """One-time kernel-friendly weight layouts (done at load time, not per forward)."""
    w_conv, b_conv, w_fc, b_fc = params
    # block-diagonal (36, 128): w_bd[q*9+t, q*32+c] = w_conv[t, c]
    w_bd = jnp.kron(jnp.eye(NCAND, dtype=w_conv.dtype), w_conv)
    b_bd = jnp.tile(b_conv, (1, NCAND))                    # (1, 128)
    return w_bd, b_bd, w_fc, b_fc


# ---------------- pure-JAX reference ----------------

def reference_forward(x_nchw, params):
    w_conv, b_conv, w_fc, b_fc = params
    B = x_nchw.shape[0]
    x2d = x_nchw[:, 0, :, :]
    xp = jnp.pad(x2d, ((0, 0), (1, 1), (1, 1)))
    taps = [xp[:, kh:kh + H, kw:kw + W] for kh in range(KH) for kw in range(KW)]
    patches = jnp.stack(taps, axis=-1).reshape(B * H * W, TAPS)
    conv = jnp.maximum(patches @ w_conv + b_conv, 0.0).reshape(B, H, W, C_OUT)
    pooled = conv.reshape(B, HP, POOL, WP, POOL, C_OUT).max(axis=(2, 4))   # (B,14,14,32)
    feat = pooled.reshape(B, FC_IN)                        # NHWC flatten order
    return feat @ w_fc.T + b_fc


if __name__ == "__main__":
    key = jax.random.PRNGKey(0)
    kx, kp = jax.random.split(key)
    # SimpleCNN's fc layer (32*14*14 inputs) pins the input to 1x28x28 images.
    x = jax.random.normal(kx, (2, 1, 28, 28), jnp.float32)
    params = init_params(kp)
    prepared = prepare_params(params)

    out = jax.block_until_ready(simple_cnn_forward(x, prepared))
    assert out.shape == (2, FC_OUT), out.shape

    ref = reference_forward(x, params)
    np.testing.assert_allclose(np.asarray(out), np.asarray(ref), rtol=2e-4, atol=2e-4)
    print("KERNEL_OK")
</pallas_src>

<mosaic_0001>
module attributes {stable_mosaic.version = 11 : i64} {
  func.func @_conv_pool_kernel(%arg0: i32, %arg1: memref<4x1x49x36xf32, #tpu.memory_space<vmem>>, %arg2: memref<36x128xf32, #tpu.memory_space<vmem>>, %arg3: memref<1x128xf32, #tpu.memory_space<vmem>>, %arg4: memref<1x49x128xf32, #tpu.memory_space<vmem>>) attributes {dimension_semantics = [#tpu.dimension_semantics<parallel>], iteration_bounds = array<i64: 2>, scalar_prefetch = 0 : i64, scratch_operands = 0 : i64, tpu.core_type = #tpu.core_type<tc>, window_params = [{transform_indices = @transform_0, window_bounds = array<i64: 4, 1, 49, 36>}, {pipeline_mode = #tpu.pipeline_mode<synchronous>, transform_indices = @transform_1, window_bounds = array<i64: 36, 128>}, {pipeline_mode = #tpu.pipeline_mode<synchronous>, transform_indices = @transform_2, window_bounds = array<i64: 1, 128>}, {transform_indices = @transform_3, window_bounds = array<i64: 1, 49, 128>}]} {
    %c0 = arith.constant 0 : index
    %c0_0 = arith.constant 0 : index
    %0 = vector.load %arg2[%c0, %c0_0] : memref<36x128xf32, #tpu.memory_space<vmem>>, vector<36x128xf32>
    %c0_1 = arith.constant 0 : index
    %c0_2 = arith.constant 0 : index
    %1 = vector.load %arg3[%c0_1, %c0_2] : memref<1x128xf32, #tpu.memory_space<vmem>>, vector<1x128xf32>
    %c0_3 = arith.constant 0 : index
    %c0_4 = arith.constant 0 : index
    %c0_5 = arith.constant 0 : index
    %c0_6 = arith.constant 0 : index
    %2 = vector.load %arg1[%c0_3, %c0_4, %c0_5, %c0_6] : memref<4x1x49x36xf32, #tpu.memory_space<vmem>>, vector<1x1x49x36xf32>
    %3 = vector.shape_cast %2 : vector<1x1x49x36xf32> to vector<49x36xf32>
    %cst = arith.constant dense<0.000000e+00> : vector<49x128xf32>
    %4 = tpu.matmul %3, %0, %cst {dimension_numbers = #tpu.dot_dimension_numbers<[1], [0], [0], [1], [0, 0, 1, 1], [], []>} : vector<49x36xf32>, vector<36x128xf32>, vector<49x128xf32> -> vector<49x128xf32>
    %c1 = arith.constant 1 : index
    %c0_7 = arith.constant 0 : index
    %c0_8 = arith.constant 0 : index
    %c0_9 = arith.constant 0 : index
    %5 = vector.load %arg1[%c1, %c0_7, %c0_8, %c0_9] : memref<4x1x49x36xf32, #tpu.memory_space<vmem>>, vector<1x1x49x36xf32>
    %6 = vector.shape_cast %5 : vector<1x1x49x36xf32> to vector<49x36xf32>
    %cst_10 = arith.constant dense<0.000000e+00> : vector<49x128xf32>
    %7 = tpu.matmul %6, %0, %cst_10 {dimension_numbers = #tpu.dot_dimension_numbers<[1], [0], [0], [1], [0, 0, 1, 1], [], []>} : vector<49x36xf32>, vector<36x128xf32>, vector<49x128xf32> -> vector<49x128xf32>
    %c2 = arith.constant 2 : index
    %c0_11 = arith.constant 0 : index
    %c0_12 = arith.constant 0 : index
    %c0_13 = arith.constant 0 : index
    %8 = vector.load %arg1[%c2, %c0_11, %c0_12, %c0_13] : memref<4x1x49x36xf32, #tpu.memory_space<vmem>>, vector<1x1x49x36xf32>
    %9 = vector.shape_cast %8 : vector<1x1x49x36xf32> to vector<49x36xf32>
    %cst_14 = arith.constant dense<0.000000e+00> : vector<49x128xf32>
    %10 = tpu.matmul %9, %0, %cst_14 {dimension_numbers = #tpu.dot_dimension_numbers<[1], [0], [0], [1], [0, 0, 1, 1], [], []>} : vector<49x36xf32>, vector<36x128xf32>, vector<49x128xf32> -> vector<49x128xf32>
    %c3 = arith.constant 3 : index
    %c0_15 = arith.constant 0 : index
    %c0_16 = arith.constant 0 : index
    %c0_17 = arith.constant 0 : index
    %11 = vector.load %arg1[%c3, %c0_15, %c0_16, %c0_17] : memref<4x1x49x36xf32, #tpu.memory_space<vmem>>, vector<1x1x49x36xf32>
    %12 = vector.shape_cast %11 : vector<1x1x49x36xf32> to vector<49x36xf32>
    %cst_18 = arith.constant dense<0.000000e+00> : vector<49x128xf32>
    %13 = tpu.matmul %12, %0, %cst_18 {dimension_numbers = #tpu.dot_dimension_numbers<[1], [0], [0], [1], [0, 0, 1, 1], [], []>} : vector<49x36xf32>, vector<36x128xf32>, vector<49x128xf32> -> vector<49x128xf32>
    %14 = arith.maximumf %4, %7 : vector<49x128xf32>
    %15 = arith.maximumf %10, %13 : vector<49x128xf32>
    %16 = arith.maximumf %14, %15 : vector<49x128xf32>
    %17 = vector.broadcast %1 : vector<1x128xf32> to vector<49x128xf32>
    %18 = arith.addf %16, %17 : vector<49x128xf32>
    %cst_19 = arith.constant 0.000000e+00 : f32
    %19 = vector.broadcast %cst_19 : f32 to vector<49x128xf32>
    %20 = arith.maximumf %18, %19 : vector<49x128xf32>
    %c0_20 = arith.constant 0 : index
    %c0_21 = arith.constant 0 : index
    %c0_22 = arith.constant 0 : index
    %21 = vector.load %arg4[%c0_20, %c0_21, %c0_22] : memref<1x49x128xf32, #tpu.memory_space<vmem>>, vector<1x49x128xf32>
    %22 = vector.shape_cast %21 : vector<1x49x128xf32> to vector<49x128xf32>
    %23 = vector.shape_cast %20 : vector<49x128xf32> to vector<1x49x128xf32>
    tpu.vector_store %arg4[%c0_20, %c0_21, %c0_22], %23 {strides = array<i32>} : memref<1x49x128xf32, #tpu.memory_space<vmem>>, vector<1x49x128xf32>,
    return
  }
  func.func @transform_0(%arg0: i32) -> (i32, i32, i32, i32) {
    %c0_i32 = arith.constant 0 : i32
    %c0_i32_0 = arith.constant 0 : i32
    %c0_i32_1 = arith.constant 0 : i32
    %c0_i32_2 = arith.constant 0 : i32
    return %c0_i32, %arg0, %c0_i32_0, %c0_i32_1 : i32, i32, i32, i32
  }
  func.func @transform_1(%arg0: i32) -> (i32, i32) {
    %c0_i32 = arith.constant 0 : i32
    %c0_i32_0 = arith.constant 0 : i32
    %c0_i32_1 = arith.constant 0 : i32
    return %c0_i32, %c0_i32_0 : i32, i32
  }
  func.func @transform_2(%arg0: i32) -> (i32, i32) {
    %c0_i32 = arith.constant 0 : i32
    %c0_i32_0 = arith.constant 0 : i32
    %c0_i32_1 = arith.constant 0 : i32
    return %c0_i32, %c0_i32_0 : i32, i32
  }
  func.func @transform_3(%arg0: i32) -> (i32, i32, i32) {
    %c0_i32 = arith.constant 0 : i32
    %c0_i32_0 = arith.constant 0 : i32
    %c0_i32_1 = arith.constant 0 : i32
    return %arg0, %c0_i32, %c0_i32_0 : i32, i32, i32
  }
}

module attributes {stable_mosaic.version = 11 : i64} {
  func.func @_fc_kernel(%arg0: i32, %arg1: memref<2x6272xf32, #tpu.memory_space<vmem>>, %arg2: memref<10x6272xf32, #tpu.memory_space<vmem>>, %arg3: memref<1x10xf32, #tpu.memory_space<vmem>>, %arg4: memref<2x10xf32, #tpu.memory_space<vmem>>) attributes {dimension_semantics = [#tpu.dimension_semantics<parallel>], iteration_bounds = array<i64: 1>, scalar_prefetch = 0 : i64, scratch_operands = 0 : i64, tpu.core_type = #tpu.core_type<tc>, window_params = [{transform_indices = @transform_0, window_bounds = array<i64: 2, 6272>}, {pipeline_mode = #tpu.pipeline_mode<synchronous>, transform_indices = @transform_1, window_bounds = array<i64: 10, 6272>}, {pipeline_mode = #tpu.pipeline_mode<synchronous>, transform_indices = @transform_2, window_bounds = array<i64: 1, 10>}, {transform_indices = @transform_3, window_bounds = array<i64: 2, 10>}]} {
    %c0 = arith.constant 0 : index
    %c0_0 = arith.constant 0 : index
    %0 = vector.load %arg1[%c0, %c0_0] : memref<2x6272xf32, #tpu.memory_space<vmem>>, vector<2x6272xf32>
    %c0_1 = arith.constant 0 : index
    %c0_2 = arith.constant 0 : index
    %1 = vector.load %arg2[%c0_1, %c0_2] : memref<10x6272xf32, #tpu.memory_space<vmem>>, vector<10x6272xf32>
    %cst = arith.constant dense<0.000000e+00> : vector<2x10xf32>
    %2 = tpu.matmul %0, %1, %cst {dimension_numbers = #tpu.dot_dimension_numbers<[1], [1], [0], [0], [0, 0, 1, 0], [], []>} : vector<2x6272xf32>, vector<10x6272xf32>, vector<2x10xf32> -> vector<2x10xf32>
    %c0_3 = arith.constant 0 : index
    %c0_4 = arith.constant 0 : index
    %3 = vector.load %arg3[%c0_3, %c0_4] : memref<1x10xf32, #tpu.memory_space<vmem>>, vector<1x10xf32>
    %4 = vector.broadcast %3 : vector<1x10xf32> to vector<2x10xf32>
    %5 = arith.addf %2, %4 : vector<2x10xf32>
    %c0_5 = arith.constant 0 : index
    %c0_6 = arith.constant 0 : index
    %6 = vector.load %arg4[%c0_5, %c0_6] : memref<2x10xf32, #tpu.memory_space<vmem>>, vector<2x10xf32>
    tpu.vector_store %arg4[%c0_5, %c0_6], %5 {strides = array<i32>} : memref<2x10xf32, #tpu.memory_space<vmem>>, vector<2x10xf32>,
    return
  }
  func.func @transform_0(%arg0: i32) -> (i32, i32) {
    %c0_i32 = arith.constant 0 : i32
    %c0_i32_0 = arith.constant 0 : i32
    return %arg0, %c0_i32 : i32, i32
  }
  func.func @transform_1(%arg0: i32) -> (i32, i32) {
    %c0_i32 = arith.constant 0 : i32
    %c0_i32_0 = arith.constant 0 : i32
    %c0_i32_1 = arith.constant 0 : i32
    return %c0_i32, %c0_i32_0 : i32, i32
  }
  func.func @transform_2(%arg0: i32) -> (i32, i32) {
    %c0_i32 = arith.constant 0 : i32
    %c0_i32_0 = arith.constant 0 : i32
    %c0_i32_1 = arith.constant 0 : i32
    return %c0_i32, %c0_i32_0 : i32, i32
  }
  func.func @transform_3(%arg0: i32) -> (i32, i32) {
    %c0_i32 = arith.constant 0 : i32
    %c0_i32_0 = arith.constant 0 : i32
    return %arg0, %c0_i32 : i32, i32
  }
}

</mosaic_0001>

<bundles_post_ra>
// kernel: simple_cnn_forward.2
= control target key start
LH: loop header
LB: loop body
LE: loop exit
PB: predicated region body
PF: predicated region fallthrough
CT: control target
= control target key end

     0   :  { %s834_s12 = smov 0   ;;  %s836_s13 = smov 0   ;;  %s1042_s0 = inlined_call_operand.vmem [shape: f32[4,2,49,36], index: 0, kind: input, shape index: {}]   ;;  %s1043_s1 = inlined_call_operand.vmem [shape: f32[36,128], index: 1, kind: input, shape index: {}]   ;;  %s1044_s2 = inlined_call_operand.vmem [shape: f32[1,128], index: 2, kind: input, shape index: {}]   ;;  %s1045_s3 = inlined_call_operand.vmem [shape: f32[2,49,128], index: 3, kind: output, shape index: {}]  }
   0x1   :  { %s838_s14 = smov 0  }
   0x2 LB: > { %s699_s15 = sadd.s32 4294967295, %s812_s14   ;;  %s851_s16 = sadd.s32 1, %s812_s14   ;;  %s812_s14 = sphi %s838_s14, %s1048_s14   ;;  %s808_s13 = sphi %s836_s13, %s1047_s13   ;;  %s804_s12 = sphi %s834_s12, %s1046_s12  }
   0x3   : > { %s17_s17 = ssub.s32 %s812_s14, %s851_s16  ;;  %s20_s18 = sadd.s32 1, %s808_s13 }
   0x4   : > { %p18_p0 = scmp.eq.s32.totalorder %s17_s17, 0  ;;  %p27_p1 = scmp.ne.s32.totalorder %s808_s13, %s804_s12 }
   0x5   : > { %p28_p2 = scmp.eq.s32.totalorder %s812_s14, 0  ;;  %p702_p4 = scmp.ge.s32.totalorder %s812_s14, 2 }
   0x6   : > { %s860_s19 = scalar_select %p18_p0, %s808_s13, %s20_s18  }
   0x7   : > { %p29_p3 = por %p28_p2, %p27_p1  ;;  %127 = sbr.rel (%p702_p4) target bundleno = 45 (0x2d), region = 24 }
   0xc   : > { %130 = sbr.rel (!%p29_p3) target bundleno = 45 (0x2d), region = 28  ;;  %s132_s20 = sand.u32 (%p29_p3), 1, %s808_s13  }
   0xd   : > { %s762_s21 = smul.u32 (%p29_p3), 56, %s812_s14 }
   0xe   : > { %s761_s22 = smul.u32 (%p29_p3), 224, %s132_s20 }
   0xf   : > { %s868_s25 = scalar_lea.vmem (%p29_p3), %s1042_s0, %s762_s21 }
  0x10   : > { %v220_v0 = vld [vmem:[%s868_s25] sm:$0xff] (%p29_p3)  ;;  %v222_v1 = vld [vmem:[%s868_s25 + $0x8] sm:$0xff] (%p29_p3)  ;;  %v224_v2 = vld [vmem:[%s868_s25 + $0x10] sm:$0xff] (%p29_p3)  ;;  %s873_s26 = scalar_lea.vmem (%p29_p3), [#allocation2], %s761_s22 }
  0x11   : > { %221 = vst [vmem:[%s873_s26] sm:$0xff] %v220_v0  ;;  %v226_v3 = vld [vmem:[%s868_s25 + $0x18] sm:$0xff]  ;;  %v228_v4 = vld [vmem:[%s868_s25 + $0x20] sm:$0xff]  ;;  %v230_v5 = vld [vmem:[%s868_s25 + $0x28] sm:$0xff] }
  0x12   : > { %223 = vst [vmem:[%s873_s26 + $0x8] sm:$0xff] %v222_v1  ;;  %v232_v6 = vld [vmem:[%s868_s25 + $0x30] sm:$0xff]  ;;  %v236_v8 = vld [vmem:[%s868_s25 + $0x78] sm:$0xff]  ;;  %v238_v9 = vld [vmem:[%s868_s25 + $0x80] sm:$0xff] }
  0x13   : > { %225 = vst [vmem:[%s873_s26 + $0x10] sm:$0xff] %v224_v2  ;;  %v234_v7 = vld [vmem:[%s868_s25 + $0x70] sm:$0xff]  ;;  %v240_v10 = vld [vmem:[%s868_s25 + $0x88] sm:$0xff]  ;;  %v244_v12 = vld [vmem:[%s868_s25 + $0x98] sm:$0xff] }
  0x14   : > { %227 = vst [vmem:[%s873_s26 + $0x18] sm:$0xff] %v226_v3  ;;  %v242_v11 = vld [vmem:[%s868_s25 + $0x90] sm:$0xff]  ;;  %v246_v13 = vld [vmem:[%s868_s25 + $0xa0] sm:$0xff]  ;;  %v250_v15 = vld [vmem:[%s868_s25 + $0xe8] sm:$0xff] }
  0x15   : > { %229 = vst [vmem:[%s873_s26 + $0x20] sm:$0xff] %v228_v4  ;;  %v248_v14 = vld [vmem:[%s868_s25 + $0xe0] sm:$0xff]  ;;  %v252_v16 = vld [vmem:[%s868_s25 + $0xf0] sm:$0xff]  ;;  %v254_v17 = vld [vmem:[%s868_s25 + $0xf8] sm:$0xff] }
  0x16   : > { %231 = vst [vmem:[%s873_s26 + $0x28] sm:$0xff] %v230_v5  ;;  %v256_v18 = vld [vmem:[%s868_s25 + $0x100] sm:$0xff]  ;;  %v258_v19 = vld [vmem:[%s868_s25 + $0x108] sm:$0xff]  ;;  %v260_v20 = vld [vmem:[%s868_s25 + $0x110] sm:$0xff] }
  0x17   : > { %233 = vst [vmem:[%s873_s26 + $0x30] sm:$0xff] %v232_v6  ;;  %v262_v21 = vld [vmem:[%s868_s25 + $0x150] sm:$0xff]  ;;  %v264_v22 = vld [vmem:[%s868_s25 + $0x158] sm:$0xff]  ;;  %v266_v23 = vld [vmem:[%s868_s25 + $0x160] sm:$0xff] }
  0x18   : > { %235 = vst [vmem:[%s873_s26 + $0x38] sm:$0xff] %v234_v7  ;;  %v268_v24 = vld [vmem:[%s868_s25 + $0x168] sm:$0xff]  ;;  %v270_v25 = vld [vmem:[%s868_s25 + $0x170] sm:$0xff]  ;;  %v272_v26 = vld [vmem:[%s868_s25 + $0x178] sm:$0xff] }
  0x19   : > { %237 = vst [vmem:[%s873_s26 + $0x40] sm:$0xff] %v236_v8  ;;  %v274_v27 = vld [vmem:[%s868_s25 + $0x180] sm:$0xff] }
  0x1a   : > { %239 = vst [vmem:[%s873_s26 + $0x48] sm:$0xff] %v238_v9 }
  0x1b   : > { %241 = vst [vmem:[%s873_s26 + $0x50] sm:$0xff] %v240_v10 }
  0x1c   : > { %243 = vst [vmem:[%s873_s26 + $0x58] sm:$0xff] %v242_v11 }
  0x1d   : > { %245 = vst [vmem:[%s873_s26 + $0x60] sm:$0xff] %v244_v12 }
  0x1e   : > { %247 = vst [vmem:[%s873_s26 + $0x68] sm:$0xff] %v246_v13 }
  0x1f   : > { %249 = vst [vmem:[%s873_s26 + $0x70] sm:$0xff] %v248_v14 }
  0x20   : > { %251 = vst [vmem:[%s873_s26 + $0x78] sm:$0xff] %v250_v15 }
  0x21   : > { %253 = vst [vmem:[%s873_s26 + $0x80] sm:$0xff] %v252_v16 }
  0x22   : > { %255 = vst [vmem:[%s873_s26 + $0x88] sm:$0xff] %v254_v17 }
  0x23   : > { %257 = vst [vmem:[%s873_s26 + $0x90] sm:$0xff] %v256_v18 }
  0x24   : > { %259 = vst [vmem:[%s873_s26 + $0x98] sm:$0xff] %v258_v19 }
  0x25   : > { %261 = vst [vmem:[%s873_s26 + $0xa0] sm:$0xff] %v260_v20 }
  0x26   : > { %263 = vst [vmem:[%s873_s26 + $0xa8] sm:$0xff] %v262_v21 }
  0x27   : > { %265 = vst [vmem:[%s873_s26 + $0xb0] sm:$0xff] %v264_v22 }
  0x28   : > { %267 = vst [vmem:[%s873_s26 + $0xb8] sm:$0xff] %v266_v23 }
  0x29   : > { %269 = vst [vmem:[%s873_s26 + $0xc0] sm:$0xff] %v268_v24 }
  0x2a   : > { %271 = vst [vmem:[%s873_s26 + $0xc8] sm:$0xff] %v270_v25 }
  0x2b   : > { %273 = vst [vmem:[%s873_s26 + $0xd0] sm:$0xff] %v272_v26 }
  0x2c   : > { %275 = vst [vmem:[%s873_s26 + $0xd8] sm:$0xff] %v274_v27 }
  0x2d PF: > { %p704_p5 = scmp.ge.s32.totalorder %s812_s14, 1  ;;  %p280_p6 = scmp.lt.s32.totalorder %s812_s14, 3 }
  0x2f   : > { %p281_p7 = pnand %p704_p5, %p280_p6 }
  0x30   : > { %s287_s4 = sand.u32 (!%p281_p7), 1, %s804_s12   ;;  %p310_p8 = scmp.lt.s32.totalorder (!%p281_p7), %s699_s15, 1 }
  0x31   : > { %284 = sbr.rel (%p281_p7) target bundleno = 253 (0xfd), region = 66 }
  0x32   : > { %s763_s5 = smul.u32 (!%p281_p7), 224, %s287_s4 }
  0x34   : > { %s946_s12 = scalar_lea.vmem (!%p281_p7), [#allocation2], %s763_s5 }
  0x36   : > { %v319_v28 = vld [vmem:[%s1043_s1 + $0x20] sm:$0xf]  ;;  %vm350_vm0 = vcmask 1043456   ;;  %v318_v29 = vld [vmem:[%s1043_s1 + $0x18] sm:$0xff]  ;;  %v317_v30 = vld [vmem:[%s1043_s1 + $0x10] sm:$0xff]  ;;  %vm328_vm1 = vcmask 293888  }
  0x37   : > { %736 = vmatpush.msk.msra.mxu2 %vm350_vm0, %v319_v28  ;;  %751 = vmatpush.msk.msra.mxu3 %vm350_vm0, %v319_v28  ;;  %v316_v31 = vld [vmem:[%s1043_s1 + $0x8] sm:$0xff]  ;;  %v315_v32 = vld [vmem:[%s1043_s1] sm:$0xff]  ;;  %v729_v33 = vld [vmem:[%s946_s12 + $0x70] sm:$0xff]  ;;  %s1050_s15 = smov (!%p310_p8, %s699_s15), 1 }
  0x38   : > { %706 = vmatpush.msk.msra.mxu0 %vm350_vm0, %v319_v28  ;;  %721 = vmatpush.msk.msra.mxu1 %vm350_vm0, %v319_v28  ;;  %v744_v34 = vld [vmem:[%s946_s12 + $0xa8] sm:$0xff]  ;;  %v321_v35 = vld [vmem:[%s946_s12] sm:$0xff]  ;;  %v714_v36 = vld [vmem:[%s946_s12 + $0x38] sm:$0xff]  ;;  %s764_s20 = smul.u32 56, %s1050_s15 }
  0x39   : > { %500 = vmatpush.msra.mxu2 %v318_v29  ;;  %567 = vmatpush.msra.mxu3 %v318_v29  ;;  %v730_v37 = vld [vmem:[%s946_s12 + $0x78] sm:$0xff]  ;;  %v745_v38 = vld [vmem:[%s946_s12 + $0xb0] sm:$0xff]  ;;  %v322_v39 = vld [vmem:[%s946_s12 + $0x8] sm:$0xff] }
  0x3a   : > { %366 = vmatpush.msra.mxu0 %v318_v29  ;;  %433 = vmatpush.msra.mxu1 %v318_v29  ;;  %v715_v40 = vld [vmem:[%s946_s12 + $0x40] sm:$0xff]  ;;  %v746_v42 = vld [vmem:[%s946_s12 + $0xb8] sm:$0xff]  ;;  %v323_v43 = vld [vmem:[%s946_s12 + $0x10] sm:$0xff]  ;;  %s1017_s14 = scalar_lea.vmem %s1045_s3, %s764_s20 }
  0x3b   : > { %501 = vmatpush.msra.mxu2 %v317_v30  ;;  %568 = vmatpush.msra.mxu3 %v317_v30  ;;  %v731_v41 = vld [vmem:[%s946_s12 + $0x80] sm:$0xff]  ;;  %v716_v44 = vld [vmem:[%s946_s12 + $0x48] sm:$0xff]  ;;  %v324_v47 = vld [vmem:[%s946_s12 + $0x18] sm:$0xff] }
  0x3c   : > { %367 = vmatpush.msra.mxu0 %v317_v30  ;;  %434 = vmatpush.msra.mxu1 %v317_v30  ;;  %v732_v45 = vld [vmem:[%s946_s12 + $0x88] sm:$0xff]  ;;  %v747_v46 = vld [vmem:[%s946_s12 + $0xc0] sm:$0xff]  ;;  %v717_v48 = vld [vmem:[%s946_s12 + $0x50] sm:$0xff] }
  0x3d   : > { %502 = vmatpush.msra.mxu2 %v316_v31  ;;  %569 = vmatpush.msra.mxu3 %v316_v31  ;;  %v733_v49 = vld [vmem:[%s946_s12 + $0x90] sm:$0xff]  ;;  %v748_v50 = vld [vmem:[%s946_s12 + $0xc8] sm:$0xff]  ;;  %v325_v51 = vld [vmem:[%s946_s12 + $0x20] sm:$0xff] }
  0x3e   : > { %368 = vmatpush.msra.mxu0 %v316_v31  ;;  %435 = vmatpush.msra.mxu1 %v316_v31  ;;  %v718_v52 = vld [vmem:[%s946_s12 + $0x58] sm:$0xff]  ;;  %v749_v54 = vld [vmem:[%s946_s12 + $0xd0] sm:$0xff]  ;;  %v326_v55 = vld [vmem:[%s946_s12 + $0x28] sm:$0xff] }
  0x3f   : > { %503 = vmatpush.msra.mxu2 %v315_v32  ;;  %570 = vmatpush.msra.mxu3 %v315_v32  ;;  %v734_v53 = vld [vmem:[%s946_s12 + $0x98] sm:$0xff]  ;;  %v719_v56 = vld [vmem:[%s946_s12 + $0x60] sm:$0xff]  ;;  %v327_v59 = vld [vmem:[%s946_s12 + $0x30] sm:$0x1] }
  0x40   : > { %737 = vmatmul.msk.f32.vlgmr.msra.gmra.mxu2 %vm328_vm1, %v729_v33  ;;  %752 = vmatmul.msk.f32.vlgmr.msra.gmra.mxu3 %vm328_vm1, %v744_v34  ;;  %v735_v57 = vld [vmem:[%s946_s12 + $0xa0] sm:$0x1]  ;;  %v750_v58 = vld [vmem:[%s946_s12 + $0xd8] sm:$0x1]  ;;  %v720_v60 = vld [vmem:[%s946_s12 + $0x68] sm:$0x1] }
  0x41   : > { %369 = vmatpush.msra.mxu0 %v315_v32  ;;  %436 = vmatpush.msra.mxu1 %v315_v32  ;;  %v1011_v3 = vld [vmem:[%s1044_s2] ss:$0 sm:$0xff] }
  0x42   : > { %707 = vmatmul.msk.f32.vlgmr.msra.gmra.mxu0 %vm328_vm1, %v321_v35  ;;  %722 = vmatmul.msk.f32.vlgmr.msra.gmra.mxu1 %vm328_vm1, %v714_v36 }
  0x48   : > { %738 = vmatmul.msk.f32.gmra.mxu2 %vm328_vm1, %v730_v37  ;;  %753 = vmatmul.msk.f32.gmra.mxu3 %vm328_vm1, %v745_v38 }
  0x4a   : > { %708 = vmatmul.msk.f32.gmra.mxu0 %vm328_vm1, %v322_v39  ;;  %723 = vmatmul.msk.f32.gmra.mxu1 %vm328_vm1, %v715_v40 }
  0x50   : > { %739 = vmatmul.msk.f32.gmra.mxu2 %vm328_vm1, %v731_v41  ;;  %754 = vmatmul.msk.f32.gmra.mxu3 %vm328_vm1, %v746_v42 }
  0x52   : > { %709 = vmatmul.msk.f32.gmra.mxu0 %vm328_vm1, %v323_v43  ;;  %724 = vmatmul.msk.f32.gmra.mxu1 %vm328_vm1, %v716_v44 }
  0x58   : > { %740 = vmatmul.msk.f32.gmra.mxu2 %vm328_vm1, %v732_v45  ;;  %755 = vmatmul.msk.f32.gmra.mxu3 %vm328_vm1, %v747_v46 }
  0x5a   : > { %710 = vmatmul.msk.f32.gmra.mxu0 %vm328_vm1, %v324_v47  ;;  %725 = vmatmul.msk.f32.gmra.mxu1 %vm328_vm1, %v717_v48 }
  0x60   : > { %741 = vmatmul.msk.f32.gmra.mxu2 %vm328_vm1, %v733_v49  ;;  %756 = vmatmul.msk.f32.gmra.mxu3 %vm328_vm1, %v748_v50 }
  0x62   : > { %711 = vmatmul.msk.f32.gmra.mxu0 %vm328_vm1, %v325_v51  ;;  %726 = vmatmul.msk.f32.gmra.mxu1 %vm328_vm1, %v718_v52 }
  0x68   : > { %742 = vmatmul.msk.f32.gmra.mxu2 %vm328_vm1, %v734_v53  ;;  %757 = vmatmul.msk.f32.gmra.mxu3 %vm328_vm1, %v749_v54 }
  0x6a   : > { %712 = vmatmul.msk.f32.gmra.mxu0 %vm328_vm1, %v326_v55  ;;  %727 = vmatmul.msk.f32.gmra.mxu1 %vm328_vm1, %v719_v56 }
  0x70   : > { %743 = vmatmul.msk.f32.gmra.mxu2 %vm328_vm1, %v735_v57  ;;  %758 = vmatmul.msk.f32.gmra.mxu3 %vm328_vm1, %v750_v58 }
  0x72   : > { %713 = vmatmul.msk.f32.gmra.mxu0 %vm328_vm1, %v327_v59  ;;  %728 = vmatmul.msk.f32.gmra.mxu1 %vm328_vm1, %v720_v60 }
  0xbf   : > { %v371_v61 = vpop.f32.mrf.mxu0  ;;  %v438_v62 = vpop.f32.mrf.mxu1 }
  0xc0   : > { %v593_v63 = vmax.f32 %v371_v61, %v438_v62 }
  0xc3   : > { %v505_v0 = vpop.f32.mrf.mxu2  ;;  %v572_v1 = vpop.f32.mrf.mxu3 }
  0xc4   : > { %v600_v2 = vmax.f32 %v505_v0, %v572_v1 }
  0xc6   : > { %v607_v4 = vmax.f32 %v593_v63, %v600_v2 }
  0xc7   : > { %v374_v5 = vpop.f32.mrf.mxu0  ;;  %v441_v6 = vpop.f32.mrf.mxu1 }
  0xc8   : > { %v617_v7 = vadd.f32 %v1011_v3, %v607_v4  ;;  %v594_v9 = vmax.f32 %v374_v5, %v441_v6 }
  0xca   : > { %v624_v8 = vmax.f32 %v617_v7, 0.0 }
  0xcb   : > { %v508_v10 = vpop.f32.mrf.mxu2  ;;  %v575_v11 = vpop.f32.mrf.mxu3 }
  0xcc   : > { %631 = vst [vmem:[%s1017_s14] sm:$0xff] %v624_v8  ;;  %v601_v12 = vmax.f32 %v508_v10, %v575_v11 }
  0xce   : > { %v608_v13 = vmax.f32 %v594_v9, %v601_v12 }
  0xcf   : > { %v377_v14 = vpop.f32.mrf.mxu0  ;;  %v444_v15 = vpop.f32.mrf.mxu1 }
  0xd0   : > { %v618_v16 = vadd.f32 %v1011_v3, %v608_v13  ;;  %v595_v18 = vmax.f32 %v377_v14, %v444_v15 }
  0xd2   : > { %v625_v17 = vmax.f32 %v618_v16, 0.0 }
  0xd3   : > { %v511_v19 = vpop.f32.mrf.mxu2  ;;  %v578_v20 = vpop.f32.mrf.mxu3 }
  0xd4   : > { %632 = vst [vmem:[%s1017_s14 + $0x8] sm:$0xff] %v625_v17  ;;  %v602_v21 = vmax.f32 %v511_v19, %v578_v20 }
  0xd6   : > { %v609_v22 = vmax.f32 %v595_v18, %v602_v21 }
  0xd7   : > { %v380_v23 = vpop.f32.mrf.mxu0  ;;  %v447_v24 = vpop.f32.mrf.mxu1 }
  0xd8   : > { %v619_v25 = vadd.f32 %v1011_v3, %v609_v22  ;;  %v596_v27 = vmax.f32 %v380_v23, %v447_v24 }
  0xda   : > { %v626_v26 = vmax.f32 %v619_v25, 0.0 }
  0xdb   : > { %v514_v28 = vpop.f32.mrf.mxu2  ;;  %v581_v29 = vpop.f32.mrf.mxu3 }
  0xdc   : > { %633 = vst [vmem:[%s1017_s14 + $0x10] sm:$0xff] %v626_v26  ;;  %v603_v30 = vmax.f32 %v514_v28, %v581_v29 }
  0xde   : > { %v610_v31 = vmax.f32 %v596_v27, %v603_v30 }
  0xdf   : > { %v383_v32 = vpop.f32.mrf.mxu0  ;;  %v450_v33 = vpop.f32.mrf.mxu1 }
  0xe0   : > { %v620_v34 = vadd.f32 %v1011_v3, %v610_v31  ;;  %v597_v36 = vmax.f32 %v383_v32, %v450_v33 }
  0xe2   : > { %v627_v35 = vmax.f32 %v620_v34, 0.0 }
  0xe3   : > { %v517_v37 = vpop.f32.mrf.mxu2  ;;  %v584_v38 = vpop.f32.mrf.mxu3 }
  0xe4   : > { %634 = vst [vmem:[%s1017_s14 + $0x18] sm:$0xff] %v627_v35  ;;  %v604_v39 = vmax.f32 %v517_v37, %v584_v38 }
  0xe6   : > { %v611_v40 = vmax.f32 %v597_v36, %v604_v39 }
  0xe7   : > { %v386_v41 = vpop.f32.mrf.mxu0  ;;  %v453_v42 = vpop.f32.mrf.mxu1 }
  0xe8   : > { %v621_v43 = vadd.f32 %v1011_v3, %v611_v40  ;;  %v598_v45 = vmax.f32 %v386_v41, %v453_v42 }
  0xea   : > { %v628_v44 = vmax.f32 %v621_v43, 0.0 }
  0xeb   : > { %v520_v46 = vpop.f32.mrf.mxu2  ;;  %v587_v47 = vpop.f32.mrf.mxu3 }
  0xec   : > { %635 = vst [vmem:[%s1017_s14 + $0x20] sm:$0xff] %v628_v44  ;;  %v605_v48 = vmax.f32 %v520_v46, %v587_v47 }
  0xee   : > { %v612_v49 = vmax.f32 %v598_v45, %v605_v48 }
  0xef   : > { %v389_v50 = vpop.f32.mrf.mxu0  ;;  %v456_v51 = vpop.f32.mrf.mxu1 }
  0xf0   : > { %v622_v52 = vadd.f32 %v1011_v3, %v612_v49  ;;  %v599_v54 = vmax.f32 %v389_v50, %v456_v51 }
  0xf2   : > { %v629_v53 = vmax.f32 %v622_v52, 0.0 }
  0xf3   : > { %v523_v55 = vpop.f32.mrf.mxu2  ;;  %v590_v56 = vpop.f32.mrf.mxu3 }
  0xf4   : > { %636 = vst [vmem:[%s1017_s14 + $0x28] sm:$0xff] %v629_v53  ;;  %v606_v57 = vmax.f32 %v523_v55, %v590_v56 }
  0xf6   : > { %v613_v58 = vmax.f32 %v599_v54, %v606_v57 }
  0xf8   : > { %v623_v59 = vadd.f32 %v1011_v3, %v613_v58 }
  0xfa   : > { %v630_v60 = vmax.f32 %v623_v59, 0.0 }
  0xfc   : > { %637 = vst [vmem:[%s1017_s14 + $0x30] sm:$0x1] %v630_v60 }
  0xfd PF: > { %p10_p9 = scmp.ge.s32.totalorder %s851_s16, 4   ;;  %s1046_s12 = smov %s808_s13 }
  0xfe   : > { %s1047_s13 = smov %s860_s19  ;;  %s1048_s14 = smov %s851_s16 }
  0xff   :  { %12 = sbr.rel (!%p10_p9) target bundleno = 2 (0x2), region = 108 }

// kernel: simple_cnn_forward.3
= control target key start
LH: loop header
LB: loop body
LE: loop exit
PB: predicated region body
PF: predicated region fallthrough
CT: control target
= control target key end

     0   :  { %s1689_s0 = inlined_call_operand.vmem [shape: f32[2,6272], index: 0, kind: input, shape index: {}]   ;;  %s1690_s1 = inlined_call_operand.vmem [shape: f32[10,6272], index: 1, kind: input, shape index: {}]   ;;  %s1691_s2 = inlined_call_operand.vmem [shape: f32[1,10], index: 2, kind: input, shape index: {}]   ;;  %s1692_s3 = inlined_call_operand.hbm [shape: f32[2,10], index: 3, kind: output, shape index: {}]  }
   0x1   :  { %v79_v0 = vld [vmem:[%s1690_s1 + $0x198] sm:$0x3]  ;;  %v77_v1 = vld [vmem:[%s1690_s1 + $0x188] sm:$0x3]  ;;  %v80_v2 = vld [vmem:[%s1690_s1 + $0x1a0] sm:$0x3] }
   0x2   :  { %309 = vmatpush.xpose.msra.mxu2 %v79_v0  ;;  %269 = vmatpush.xpose.msra.mxu0 %v77_v1  ;;  %v78_v3 = vld [vmem:[%s1690_s1 + $0x190] sm:$0x3]  ;;  %v28_v5 = vld [vmem:[%s1690_s1] sm:$0xff]  ;;  %v31_v7 = vld [vmem:[%s1690_s1 + $0x18] sm:$0xff] }
   0x3   :  { %329 = vmatpush.xpose.msra.mxu3 %v80_v2  ;;  %289 = vmatpush.xpose.msra.mxu1 %v78_v3  ;;  %v30_v4 = vld [vmem:[%s1690_s1 + $0x10] sm:$0xff]  ;;  %v15_v6 = vld [vmem:[%s1689_s0] sm:$0xff]  ;;  %v83_v8 = vld [vmem:[%s1690_s1 + $0x1b8] sm:$0x3] }
   0x4   :  { %143 = vst [vmem:[#allocation1] ss:$4 sm:$0xff] %v15_v6  ;;  %v29_v9 = vld [vmem:[%s1690_s1 + $0x8] sm:$0xff]  ;;  %v84_v11 = vld [vmem:[%s1690_s1 + $0x1c0] sm:$0x3]  ;;  %v34_v14 = vld [vmem:[%s1690_s1 + $0x30] sm:$0xff] }
   0x5   :  { %v81_v10 = vld [vmem:[%s1690_s1 + $0x1a8] sm:$0x3]  ;;  %v82_v12 = vld [vmem:[%s1690_s1 + $0x1b0] sm:$0x3]  ;;  %v32_v16 = vld [vmem:[%s1690_s1 + $0x20] sm:$0xff] }
   0x6   :  { %310 = vmatpush.xpose.msra.mxu2 %v30_v4  ;;  %270 = vmatpush.xpose.msra.mxu0 %v28_v5  ;;  %v16_v13 = vld [vmem:[%s1689_s0 + $0x8] sm:$0xff]  ;;  %v17_v15 = vld [vmem:[%s1689_s0 + $0x10] sm:$0xff]  ;;  %v35_v17 = vld [vmem:[%s1690_s1 + $0x38] sm:$0xff] }
   0x7   :  { %330 = vmatpush.xpose.msra.mxu3 %v31_v7  ;;  %290 = vmatpush.xpose.msra.mxu1 %v29_v9  ;;  %145 = vst [vmem:[#allocation1 + $0x20] ss:$4 sm:$0xff] %v16_v13  ;;  %v33_v18 = vld [vmem:[%s1690_s1 + $0x28] sm:$0xff]  ;;  %v87_v19 = vld [vmem:[%s1690_s1 + $0x1d8] sm:$0x3]  ;;  %v38_v28 = vld [vmem:[%s1690_s1 + $0x50] sm:$0xff] }
   0x8   :  { %v85_v24 = vld [vmem:[%s1690_s1 + $0x1c8] sm:$0x3]  ;;  %v88_v25 = vld [vmem:[%s1690_s1 + $0x1e0] sm:$0x3]  ;;  %v18_v26 = vld [vmem:[%s1689_s0 + $0x18] sm:$0xff] }
   0x9   :  { %v86_v27 = vld [vmem:[%s1690_s1 + $0x1d0] sm:$0x3]  ;;  %v36_v33 = vld [vmem:[%s1690_s1 + $0x40] sm:$0xff]  ;;  %v39_v34 = vld [vmem:[%s1690_s1 + $0x58] sm:$0xff] }
   0xa   :  { %389 = vmatpush.xpose.msrb.mxu2 %v83_v8  ;;  %349 = vmatpush.xpose.msrb.mxu0 %v81_v10  ;;  %v37_v35 = vld [vmem:[%s1690_s1 + $0x48] sm:$0xff]  ;;  %v91_v36 = vld [vmem:[%s1690_s1 + $0x1f8] sm:$0x3]  ;;  %v92_v38 = vld [vmem:[%s1690_s1 + $0x200] sm:$0x3] }
   0xb   :  { %409 = vmatpush.xpose.msrb.mxu3 %v84_v11  ;;  %369 = vmatpush.xpose.msrb.mxu1 %v82_v12  ;;  %v148_v20 = vld.sshfl [vmem:[#allocation1 + $0x10] sm:$0xff pattern:$0x73625140]  ;;  %v146_v21 = vld.sshfl [vmem:[#allocation1] sm:$0xff pattern:$0x73625140] }
   0xc   :  { %311 = vmatmul.f32.vlgmr.msra.gmra.mxu2 %v148_v20  ;;  %271 = vmatmul.f32.vlgmr.msra.gmra.mxu0 %v146_v21  ;;  %v149_v22 = vld.sshfl [vmem:[#allocation1 + $0x18] sm:$0xff pattern:$0x73625140]  ;;  %v147_v23 = vld.sshfl [vmem:[#allocation1 + $0x8] sm:$0xff pattern:$0x73625140] }
   0xd   :  { %331 = vmatmul.f32.vlgmr.msra.gmra.mxu3 %v149_v22  ;;  %154 = vst [vmem:[#allocation1] ss:$4 sm:$0xff] %v17_v15  ;;  %291 = vmatmul.f32.vlgmr.msra.gmra.mxu1 %v147_v23  ;;  %v89_v37 = vld [vmem:[%s1690_s1 + $0x1e8] sm:$0x3]  ;;  %v19_v39 = vld [vmem:[%s1689_s0 + $0x20] sm:$0xff]  ;;  %v42_v45 = vld [vmem:[%s1690_s1 + $0x70] sm:$0xff] }
   0xe   :  { %390 = vmatpush.xpose.msrb.mxu2 %v34_v14  ;;  %350 = vmatpush.xpose.msrb.mxu0 %v32_v16  ;;  %v152_v29 = vld.sshfl [vmem:[#allocation1 + $0x30] sm:$0xff pattern:$0x73625140]  ;;  %v150_v30 = vld.sshfl [vmem:[#allocation1 + $0x20] sm:$0xff pattern:$0x73625140] }
   0xf   :  { %410 = vmatpush.xpose.msrb.mxu3 %v35_v17  ;;  %370 = vmatpush.xpose.msrb.mxu1 %v33_v18  ;;  %v153_v31 = vld.sshfl [vmem:[#allocation1 + $0x38] sm:$0xff pattern:$0x73625140]  ;;  %v151_v32 = vld.sshfl [vmem:[#allocation1 + $0x28] sm:$0xff pattern:$0x73625140] }
  0x10   :  { %155 = vst [vmem:[#allocation1 + $0x20] ss:$4 sm:$0xff] %v18_v26  ;;  %v90_v44 = vld [vmem:[%s1690_s1 + $0x1f0] sm:$0x3]  ;;  %v20_v46 = vld [vmem:[%s1689_s0 + $0x28] sm:$0xff]  ;;  %v40_v51 = vld [vmem:[%s1690_s1 + $0x60] sm:$0xff] }
  0x11   :  { %v43_v52 = vld [vmem:[%s1690_s1 + $0x78] sm:$0xff]  ;;  %v41_v53 = vld [vmem:[%s1690_s1 + $0x68] sm:$0xff]  ;;  %v96_v56 = vld [vmem:[%s1690_s1 + $0x220] sm:$0x3] }
  0x12   :  { %469 = vmatpush.xpose.msra.mxu2 %v87_v19  ;;  %429 = vmatpush.xpose.msra.mxu0 %v85_v24  ;;  %v95_v54 = vld [vmem:[%s1690_s1 + $0x218] sm:$0x3]  ;;  %v93_v55 = vld [vmem:[%s1690_s1 + $0x208] sm:$0x3]  ;;  %v94_v57 = vld [vmem:[%s1690_s1 + $0x210] sm:$0x3] }
  0x13   :  { %489 = vmatpush.xpose.msra.mxu3 %v88_v25  ;;  %449 = vmatpush.xpose.msra.mxu1 %v86_v27  ;;  %v21_v62 = vld [vmem:[%s1689_s0 + $0x30] sm:$0xff]  ;;  %v44_v0 = vld [vmem:[%s1690_s1 + $0x80] sm:$0xff]  ;;  %v47_v1 = vld [vmem:[%s1690_s1 + $0x98] sm:$0xff] }
  0x14   :  { %391 = vmatmul.f32.vlgmr.msrb.gmra.mxu2 %v152_v29  ;;  %351 = vmatmul.f32.vlgmr.msrb.gmra.mxu0 %v150_v30  ;;  %v158_v40 = vld.sshfl [vmem:[#allocation1 + $0x10] sm:$0xff pattern:$0x73625140]  ;;  %v156_v41 = vld.sshfl [vmem:[#allocation1] sm:$0xff pattern:$0x73625140] }
  0x15   :  { %411 = vmatmul.f32.vlgmr.msrb.gmra.mxu3 %v153_v31  ;;  %371 = vmatmul.f32.vlgmr.msrb.gmra.mxu1 %v151_v32  ;;  %v159_v42 = vld.sshfl [vmem:[#allocation1 + $0x18] sm:$0xff pattern:$0x73625140]  ;;  %v157_v43 = vld.sshfl [vmem:[#allocation1 + $0x8] sm:$0xff pattern:$0x73625140] }
  0x16   :  { %470 = vmatpush.xpose.msra.mxu2 %v38_v28  ;;  %430 = vmatpush.xpose.msra.mxu0 %v36_v33  ;;  %164 = vst [vmem:[#allocation1] ss:$4 sm:$0xff] %v19_v39  ;;  %v46_v63 = vld [vmem:[%s1690_s1 + $0x90] sm:$0xff]  ;;  %v99_v2 = vld [vmem:[%s1690_s1 + $0x238] sm:$0x3]  ;;  %v45_v3 = vld [vmem:[%s1690_s1 + $0x88] sm:$0xff] }
  0x17   :  { %490 = vmatpush.xpose.msra.mxu3 %v39_v34  ;;  %450 = vmatpush.xpose.msra.mxu1 %v37_v35  ;;  %v162_v47 = vld.sshfl [vmem:[#allocation1 + $0x30] sm:$0xff pattern:$0x73625140]  ;;  %v160_v48 = vld.sshfl [vmem:[#allocation1 + $0x20] sm:$0xff pattern:$0x73625140] }
  0x18   :  { %v163_v49 = vld.sshfl [vmem:[#allocation1 + $0x38] sm:$0xff pattern:$0x73625140]  ;;  %v161_v50 = vld.sshfl [vmem:[#allocation1 + $0x28] sm:$0xff pattern:$0x73625140] }
  0x19   :  { %165 = vst [vmem:[#allocation1 + $0x20] ss:$4 sm:$0xff] %v20_v46  ;;  %v97_v4 = vld [vmem:[%s1690_s1 + $0x228] sm:$0x3]  ;;  %v100_v8 = vld [vmem:[%s1690_s1 + $0x240] sm:$0x3] }
  0x1a   :  { %549 = vmatpush.xpose.msrb.mxu2 %v91_v36  ;;  %509 = vmatpush.xpose.msrb.mxu0 %v89_v37  ;;  %v22_v10 = vld [vmem:[%s1689_s0 + $0x38] sm:$0xff]  ;;  %v98_v11 = vld [vmem:[%s1690_s1 + $0x230] sm:$0x3]  ;;  %v23_v17 = vld [vmem:[%s1689_s0 + $0x40] sm:$0xff] }
  0x1b   :  { %569 = vmatpush.xpose.msrb.mxu3 %v92_v38  ;;  %529 = vmatpush.xpose.msrb.mxu1 %v90_v44  ;;  %v50_v12 = vld [vmem:[%s1690_s1 + $0xb0] sm:$0xff]  ;;  %v48_v18 = vld [vmem:[%s1690_s1 + $0xa0] sm:$0xff]  ;;  %v51_v19 = vld [vmem:[%s1690_s1 + $0xb8] sm:$0xff] }
  0x1c   :  { %471 = vmatmul.f32.vlgmr.msra.gmra.mxu2 %v158_v40  ;;  %431 = vmatmul.f32.vlgmr.msra.gmra.mxu0 %v156_v41 }
  0x1d   :  { %491 = vmatmul.f32.vlgmr.msra.gmra.mxu3 %v159_v42  ;;  %451 = vmatmul.f32.vlgmr.msra.gmra.mxu1 %v157_v43  ;;  %v168_v58 = vld.sshfl [vmem:[#allocation1 + $0x10] sm:$0xff pattern:$0x73625140]  ;;  %v166_v59 = vld.sshfl [vmem:[#allocation1] sm:$0xff pattern:$0x73625140] }
  0x1e   :  { %550 = vmatpush.xpose.msrb.mxu2 %v42_v45  ;;  %510 = vmatpush.xpose.msrb.mxu0 %v40_v51  ;;  %v169_v60 = vld.sshfl [vmem:[#allocation1 + $0x18] sm:$0xff pattern:$0x73625140]  ;;  %v167_v61 = vld.sshfl [vmem:[#allocation1 + $0x8] sm:$0xff pattern:$0x73625140] }
  0x1f   :  { %570 = vmatpush.xpose.msrb.mxu3 %v43_v52  ;;  %530 = vmatpush.xpose.msrb.mxu1 %v41_v53  ;;  %174 = vst [vmem:[#allocation1] ss:$4 sm:$0xff] %v21_v62 }
  0x20   :  { %v172_v5 = vld.sshfl [vmem:[#allocation1 + $0x30] sm:$0xff pattern:$0x73625140]  ;;  %v170_v6 = vld.sshfl [vmem:[#allocation1 + $0x20] sm:$0xff pattern:$0x73625140] }
  0x21   :  { %v173_v7 = vld.sshfl [vmem:[#allocation1 + $0x38] sm:$0xff pattern:$0x73625140]  ;;  %v171_v9 = vld.sshfl [vmem:[#allocation1 + $0x28] sm:$0xff pattern:$0x73625140] }
  0x22   :  { %629 = vmatpush.xpose.msra.mxu2 %v95_v54  ;;  %589 = vmatpush.xpose.msra.mxu0 %v93_v55  ;;  %175 = vst [vmem:[#allocation1 + $0x20] ss:$4 sm:$0xff] %v22_v10 }
  0x23   :  { %649 = vmatpush.xpose.msra.mxu3 %v96_v56  ;;  %609 = vmatpush.xpose.msra.mxu1 %v94_v57 }
  0x24   :  { %551 = vmatmul.f32.vlgmr.msrb.gmra.mxu2 %v162_v47  ;;  %511 = vmatmul.f32.vlgmr.msrb.gmra.mxu0 %v160_v48 }
  0x25   :  { %571 = vmatmul.f32.vlgmr.msrb.gmra.mxu3 %v163_v49  ;;  %531 = vmatmul.f32.vlgmr.msrb.gmra.mxu1 %v161_v50 }
  0x26   :  { %630 = vmatpush.xpose.msra.mxu2 %v46_v63  ;;  %590 = vmatpush.xpose.msra.mxu0 %v44_v0  ;;  %v1461_v13 = vld.sshfl [vmem:[#allocation1 + $0x10] sm:$0xff pattern:$0x73625140]  ;;  %v1463_v14 = vld.sshfl [vmem:[#allocation1] sm:$0xff pattern:$0x73625140] }
  0x27   :  { %650 = vmatpush.xpose.msra.mxu3 %v47_v1  ;;  %610 = vmatpush.xpose.msra.mxu1 %v45_v3  ;;  %v1465_v15 = vld.sshfl [vmem:[#allocation1 + $0x18] sm:$0xff pattern:$0x73625140]  ;;  %v1467_v16 = vld.sshfl [vmem:[#allocation1 + $0x8] sm:$0xff pattern:$0x73625140] }
  0x28   :  { %184 = vst [vmem:[#allocation1] ss:$4 sm:$0xff] %v23_v17 }
  0x2a   :  { %709 = vmatpush.xpose.msrb.mxu2 %v99_v2  ;;  %669 = vmatpush.xpose.msrb.mxu0 %v97_v4 }
  0x2b   :  { %729 = vmatpush.xpose.msrb.mxu3 %v100_v8  ;;  %689 = vmatpush.xpose.msrb.mxu1 %v98_v11 }
  0x2e   :  { %710 = vmatpush.xpose.msrb.mxu2 %v50_v12 }
  0x2f   :  { %8 = vsyncpa [#allocation3], 0  ;;  %631 = vmatmul.f32.vlgmr.msra.gmra.mxu2 %v168_v58  ;;  %591 = vmatmul.f32.vlgmr.msra.gmra.mxu0 %v166_v59  ;;  %v49_v20 = vld [vmem:[%s1690_s1 + $0xa8] sm:$0xff]  ;;  %v103_v21 = vld [vmem:[%s1690_s1 + $0x258] sm:$0x3]  ;;  %s1244_s20 = sshll.u32 %s1692_s3, 4  ;;  %s1245_s20 = int_to_ptr.hbm [resolvable:$true] %s1244_s20 }
  0x30   :  { %v101_v22 = vld [vmem:[%s1690_s1 + $0x248] sm:$0x3]  ;;  %651 = vmatmul.f32.vlgmr.msra.gmra.mxu3 %v169_v60  ;;  %611 = vmatmul.f32.vlgmr.msra.gmra.mxu1 %v167_v61  ;;  %v104_v23 = vld [vmem:[%s1690_s1 + $0x260] sm:$0x3]  ;;  %v102_v24 = vld [vmem:[%s1690_s1 + $0x250] sm:$0x3] }
  0x31   :  { %v24_v25 = vld [vmem:[%s1689_s0 + $0x48] sm:$0xff]  ;;  %670 = vmatpush.xpose.msrb.mxu0 %v48_v18  ;;  %730 = vmatpush.xpose.msrb.mxu3 %v51_v19  ;;  %v1496_v26 = vld.sshfl [vmem:[#allocation1 + $0x30] sm:$0xff pattern:$0x73625140]  ;;  %v52_v31 = vld [vmem:[%s1690_s1 + $0xc0] sm:$0xff]  ;;  %vm1235_vm0 = vcmask 74752  }
  0x32   :  { %v1498_v27 = vld.sshfl [vmem:[#allocation1 + $0x20] sm:$0xff pattern:$0x73625140]  ;;  %690 = vmatpush.xpose.msrb.mxu1 %v49_v20  ;;  %789 = vmatpush.xpose.msra.mxu2 %v103_v21  ;;  %v1500_v28 = vld.sshfl [vmem:[#allocation1 + $0x38] sm:$0xff pattern:$0x73625140] }
  0x33   :  { %v1502_v29 = vld.sshfl [vmem:[#allocation1 + $0x28] sm:$0xff pattern:$0x73625140]  ;;  %v54_v30 = vld [vmem:[%s1690_s1 + $0xd0] sm:$0xff]  ;;  %v55_v32 = vld [vmem:[%s1690_s1 + $0xd8] sm:$0xff] }
  0x34   :  { %185 = vst [vmem:[#allocation1 + $0x20] ss:$4 sm:$0xff] %v24_v25  ;;  %v107_v33 = vld [vmem:[%s1690_s1 + $0x278] sm:$0x3]  ;;  %v53_v34 = vld [vmem:[%s1690_s1 + $0xc8] sm:$0xff]  ;;  %v25_v39 = vld [vmem:[%s1689_s0 + $0x50] sm:$0xff] }
  0x35   :  { %749 = vmatpush.xpose.msra.mxu0 %v101_v22  ;;  %809 = vmatpush.xpose.msra.mxu3 %v104_v23  ;;  %v105_v35 = vld [vmem:[%s1690_s1 + $0x268] sm:$0x3]  ;;  %v1522_v36 = vld.sshfl [vmem:[#allocation1 + $0x10] sm:$0xff pattern:$0x73625140]  ;;  %v56_v44 = vld [vmem:[%s1690_s1 + $0xe0] sm:$0xff] }
  0x36   :  { %769 = vmatpush.xpose.msra.mxu1 %v102_v24  ;;  %790 = vmatpush.xpose.msra.mxu2 %v54_v30  ;;  %v108_v37 = vld [vmem:[%s1690_s1 + $0x280] sm:$0x3]  ;;  %v1532_v40 = vld.sshfl [vmem:[#allocation1 + $0x18] sm:$0xff pattern:$0x73625140]  ;;  %v58_v43 = vld [vmem:[%s1690_s1 + $0xf0] sm:$0xff] }
  0x37   :  { %711 = vmatmul.f32.vlgmr.msrb.gmra.mxu2 %v172_v5  ;;  %671 = vmatmul.f32.vlgmr.msrb.gmra.mxu0 %v170_v6  ;;  %v1527_v38 = vld.sshfl [vmem:[#allocation1] sm:$0xff pattern:$0x73625140]  ;;  %v1534_v41 = vld.sshfl [vmem:[#allocation1 + $0x8] sm:$0xff pattern:$0x73625140] }
  0x38   :  { %731 = vmatmul.f32.vlgmr.msrb.gmra.mxu3 %v173_v7  ;;  %691 = vmatmul.f32.vlgmr.msrb.gmra.mxu1 %v171_v9  ;;  %v106_v42 = vld [vmem:[%s1690_s1 + $0x270] sm:$0x3]  ;;  %194 = vst [vmem:[#allocation1] ss:$4 sm:$0xff] %v25_v39  ;;  %v59_v48 = vld [vmem:[%s1690_s1 + $0xf8] sm:$0xff]  ;;  %v57_v51 = vld [vmem:[%s1690_s1 + $0xe8] sm:$0xff] }
  0x39   :  { %750 = vmatpush.xpose.msra.mxu0 %v52_v31  ;;  %810 = vmatpush.xpose.msra.mxu3 %v55_v32  ;;  %v26_v50 = vld [vmem:[%s1689_s0 + $0x58] sm:$0xff]  ;;  %v109_v53 = vld [vmem:[%s1690_s1 + $0x288] sm:$0x3]  ;;  %v112_v54 = vld [vmem:[%s1690_s1 + $0x2a0] sm:$0x3] }
  0x3a   :  { %770 = vmatpush.xpose.msra.mxu1 %v53_v34  ;;  %869 = vmatpush.xpose.msrb.mxu2 %v107_v33  ;;  %v111_v52 = vld [vmem:[%s1690_s1 + $0x298] sm:$0x3]  ;;  %v110_v55 = vld [vmem:[%s1690_s1 + $0x290] sm:$0x3]  ;;  %v60_v57 = vld [vmem:[%s1690_s1 + $0x100] sm:$0xff] }
  0x3b   :  { %v1545_v45 = vld.sshfl [vmem:[#allocation1 + $0x30] sm:$0xff pattern:$0x73625140]  ;;  %v1547_v46 = vld.sshfl [vmem:[#allocation1 + $0x20] sm:$0xff pattern:$0x73625140] }
  0x3c   :  { %v1549_v47 = vld.sshfl [vmem:[#allocation1 + $0x38] sm:$0xff pattern:$0x73625140]  ;;  %v1554_v49 = vld.sshfl [vmem:[#allocation1 + $0x28] sm:$0xff pattern:$0x73625140] }
  0x3d   :  { %829 = vmatpush.xpose.msrb.mxu0 %v105_v35  ;;  %889 = vmatpush.xpose.msrb.mxu3 %v108_v37  ;;  %195 = vst [vmem:[#allocation1 + $0x20] ss:$4 sm:$0xff] %v26_v50  ;;  %v62_v56 = vld [vmem:[%s1690_s1 + $0x110] sm:$0xff]  ;;  %v63_v58 = vld [vmem:[%s1690_s1 + $0x118] sm:$0xff]  ;;  %v113_v60 = vld [vmem:[%s1690_s1 + $0x2a8] sm:$0x3] }
  0x3e   :  { %849 = vmatpush.xpose.msrb.mxu1 %v106_v42  ;;  %870 = vmatpush.xpose.msrb.mxu2 %v58_v43  ;;  %v115_v59 = vld [vmem:[%s1690_s1 + $0x2b8] sm:$0x3]  ;;  %v116_v61 = vld [vmem:[%s1690_s1 + $0x2c0] sm:$0x3]  ;;  %v61_v62 = vld [vmem:[%s1690_s1 + $0x108] sm:$0xff] }
  0x3f   :  { %791 = vmatmul.f32.vlgmr.msra.gmra.mxu2 %v1461_v13  ;;  %751 = vmatmul.f32.vlgmr.msra.gmra.mxu0 %v1463_v14  ;;  %v114_v63 = vld [vmem:[%s1690_s1 + $0x2b0] sm:$0x3]  ;;  %v196_v1 = vld.sshfl [vmem:[#allocation1] sm:$0xff pattern:$0x73625140]  ;;  %v67_v7 = vld [vmem:[%s1690_s1 + $0x138] sm:$0xff] }
  0x40   :  { %811 = vmatmul.f32.vlgmr.msra.gmra.mxu3 %v1465_v15  ;;  %771 = vmatmul.f32.vlgmr.msra.gmra.mxu1 %v1467_v16  ;;  %v198_v0 = vld.sshfl [vmem:[#allocation1 + $0x10] sm:$0xff pattern:$0x73625140]  ;;  %v199_v2 = vld.sshfl [vmem:[#allocation1 + $0x18] sm:$0xff pattern:$0x73625140] }
  0x41   :  { %830 = vmatpush.xpose.msrb.mxu0 %v56_v44  ;;  %890 = vmatpush.xpose.msrb.mxu3 %v59_v48  ;;  %v197_v3 = vld.sshfl [vmem:[#allocation1 + $0x8] sm:$0xff pattern:$0x73625140]  ;;  %v27_v4 = vld [vmem:[%s1689_s0 + $0x60] sm:$0x3]  ;;  %v66_v5 = vld [vmem:[%s1690_s1 + $0x130] sm:$0xff] }
  0x42   :  { %850 = vmatpush.xpose.msrb.mxu1 %v57_v51  ;;  %949 = vmatpush.xpose.msra.mxu2 %v111_v52  ;;  %204 = vst [vmem:[#allocation1] ss:$4 sm:$0xff] %v27_v4  ;;  %v64_v6 = vld [vmem:[%s1690_s1 + $0x120] sm:$0xff]  ;;  %v65_v8 = vld [vmem:[%s1690_s1 + $0x128] sm:$0xff]  ;;  %v119_v9 = vld [vmem:[%s1690_s1 + $0x2d8] sm:$0x3] }
  0x43   :  { %v117_v10 = vld [vmem:[%s1690_s1 + $0x2c8] sm:$0x3]  ;;  %v120_v11 = vld [vmem:[%s1690_s1 + $0x2e0] sm:$0x3]  ;;  %v118_v12 = vld [vmem:[%s1690_s1 + $0x2d0] sm:$0x3] }
  0x44   :  { %v70_v13 = vld [vmem:[%s1690_s1 + $0x150] sm:$0xff]  ;;  %v68_v14 = vld [vmem:[%s1690_s1 + $0x140] sm:$0xff]  ;;  %v71_v15 = vld [vmem:[%s1690_s1 + $0x158] sm:$0xff] }
  0x45   :  { %909 = vmatpush.xpose.msra.mxu0 %v109_v53  ;;  %969 = vmatpush.xpose.msra.mxu3 %v112_v54  ;;  %v69_v16 = vld [vmem:[%s1690_s1 + $0x148] sm:$0xff]  ;;  %v123_v17 = vld [vmem:[%s1690_s1 + $0x2f8] sm:$0x3]  ;;  %v124_v19 = vld [vmem:[%s1690_s1 + $0x300] sm:$0x3] }
  0x46   :  { %929 = vmatpush.xpose.msra.mxu1 %v110_v55  ;;  %950 = vmatpush.xpose.msra.mxu2 %v62_v56  ;;  %v121_v18 = vld [vmem:[%s1690_s1 + $0x2e8] sm:$0x3]  ;;  %v122_v20 = vld [vmem:[%s1690_s1 + $0x2f0] sm:$0x3]  ;;  %v72_v22 = vld [vmem:[%s1690_s1 + $0x160] sm:$0xff] }
  0x47   :  { %871 = vmatmul.f32.vlgmr.msrb.gmra.mxu2 %v1496_v26  ;;  %831 = vmatmul.f32.vlgmr.msrb.gmra.mxu0 %v1498_v27  ;;  %v74_v21 = vld [vmem:[%s1690_s1 + $0x170] sm:$0xff]  ;;  %v75_v23 = vld [vmem:[%s1690_s1 + $0x178] sm:$0xff]  ;;  %v73_v24 = vld [vmem:[%s1690_s1 + $0x168] sm:$0xff] }
  0x48   :  { %891 = vmatmul.f32.vlgmr.msrb.gmra.mxu3 %v1500_v28  ;;  %851 = vmatmul.f32.vlgmr.msrb.gmra.mxu1 %v1502_v29  ;;  %v125_v25 = vld [vmem:[%s1690_s1 + $0x308] sm:$0x3]  ;;  %v76_v26 = vld [vmem:[%s1690_s1 + $0x180] sm:$0xff]  ;;  %v202_v27 = vld.sshfl [vmem:[#allocation1 + $0x30] sm:$0xff pattern:$0x73625140] }
  0x49   :  { %910 = vmatpush.xpose.msra.mxu0 %v60_v57  ;;  %970 = vmatpush.xpose.msra.mxu3 %v63_v58  ;;  %v200_v28 = vld.sshfl [vmem:[#allocation1 + $0x20] sm:$0xff pattern:$0x73625140]  ;;  %v203_v29 = vld.sshfl [vmem:[#allocation1 + $0x38] sm:$0xff pattern:$0x73625140] }
  0x4a   :  { %930 = vmatpush.xpose.msra.mxu1 %v61_v62  ;;  %1029 = vmatpush.xpose.msrb.mxu2 %v115_v59  ;;  %v201_v30 = vld.sshfl [vmem:[#allocation1 + $0x28] sm:$0xff pattern:$0x73625140]  ;;  %v205_v31 = vld.sshfl [vmem:[#allocation1] sm:$0xff pattern:$0x73625140] }
  0x4b   :  { %v1254_v32 = vld [vmem:[%s1691_s2] ss:$0 sm:$0xff]  ;;  %s1281_s1 = smov [#allocation2]  }
  0x4c   :  { %s1242_s2 = sshll.u32 %s1281_s1, 4  ;;  %s1243_s2 = int_to_ptr.vmem [resolvable:$true] %s1242_s2 }
  0x4d   :  { %989 = vmatpush.xpose.msrb.mxu0 %v113_v60  ;;  %1049 = vmatpush.xpose.msrb.mxu3 %v116_v61 }
  0x4e   :  { %1009 = vmatpush.xpose.msrb.mxu1 %v114_v63  ;;  %1030 = vmatpush.xpose.msrb.mxu2 %v66_v5 }
  0x4f   :  { %951 = vmatmul.f32.vlgmr.msra.gmra.mxu2 %v1522_v36  ;;  %911 = vmatmul.f32.vlgmr.msra.gmra.mxu0 %v1527_v38 }
  0x50   :  { %971 = vmatmul.f32.vlgmr.msra.gmra.mxu3 %v1532_v40  ;;  %931 = vmatmul.f32.vlgmr.msra.gmra.mxu1 %v1534_v41 }
  0x51   :  { %990 = vmatpush.xpose.msrb.mxu0 %v64_v6  ;;  %1050 = vmatpush.xpose.msrb.mxu3 %v67_v7 }
  0x52   :  { %1010 = vmatpush.xpose.msrb.mxu1 %v65_v8  ;;  %1109 = vmatpush.xpose.msra.mxu2 %v119_v9 }
  0x55   :  { %1069 = vmatpush.xpose.msra.mxu0 %v117_v10  ;;  %1129 = vmatpush.xpose.msra.mxu3 %v120_v11 }
  0x56   :  { %1089 = vmatpush.xpose.msra.mxu1 %v118_v12  ;;  %1110 = vmatpush.xpose.msra.mxu2 %v70_v13 }
  0x57   :  { %1031 = vmatmul.f32.vlgmr.msrb.gmra.mxu2 %v1545_v45  ;;  %991 = vmatmul.f32.vlgmr.msrb.gmra.mxu0 %v1547_v46 }
  0x58   :  { %1051 = vmatmul.f32.vlgmr.msrb.gmra.mxu3 %v1549_v47  ;;  %1011 = vmatmul.f32.vlgmr.msrb.gmra.mxu1 %v1554_v49 }
  0x59   :  { %1070 = vmatpush.xpose.msra.mxu0 %v68_v14  ;;  %1130 = vmatpush.xpose.msra.mxu3 %v71_v15 }
  0x5a   :  { %1090 = vmatpush.xpose.msra.mxu1 %v69_v16  ;;  %1189 = vmatpush.xpose.msrb.mxu2 %v123_v17 }
  0x5d   :  { %1149 = vmatpush.xpose.msrb.mxu0 %v121_v18  ;;  %1209 = vmatpush.xpose.msrb.mxu3 %v124_v19 }
  0x5e   :  { %1169 = vmatpush.xpose.msrb.mxu1 %v122_v20  ;;  %1190 = vmatpush.xpose.msrb.mxu2 %v74_v21 }
  0x5f   :  { %1111 = vmatmul.f32.vlgmr.msra.gmra.mxu2 %v198_v0  ;;  %1071 = vmatmul.f32.vlgmr.msra.gmra.mxu0 %v196_v1 }
  0x60   :  { %1131 = vmatmul.f32.vlgmr.msra.gmra.mxu3 %v199_v2  ;;  %1091 = vmatmul.f32.vlgmr.msra.gmra.mxu1 %v197_v3 }
  0x61   :  { %1150 = vmatpush.xpose.msrb.mxu0 %v72_v22  ;;  %1210 = vmatpush.xpose.msrb.mxu3 %v75_v23 }
  0x62   :  { %1170 = vmatpush.xpose.msrb.mxu1 %v73_v24 }
  0x65   :  { %1229 = vmatpush.xpose.msra.mxu0 %v125_v25 }
  0x67   :  { %1191 = vmatmul.f32.vlgmr.msrb.gmra.mxu2 %v202_v27  ;;  %1151 = vmatmul.f32.vlgmr.msrb.gmra.mxu0 %v200_v28 }
  0x68   :  { %1211 = vmatmul.f32.vlgmr.msrb.gmra.mxu3 %v203_v29  ;;  %1171 = vmatmul.f32.vlgmr.msrb.gmra.mxu1 %v201_v30 }
  0x69   :  { %1230 = vmatpush.xpose.msra.mxu0 %v76_v26 }
  0x6f   :  { %1231 = vmatmul.f32.vlgmr.msra.gmra.mxu0 %v205_v31 }
  0x89   :  { %v272_v33 = vpop.f32.mrf.mxu0 }
  0x8a   :  { %v273_v34 = vadd.f32 %v1254_v32, %v272_v33  ;;  %v292_v35 = vpop.f32.mrf.mxu1 }
  0x8c   :  { %v293_v36 = vadd.f32 %v292_v35, %v273_v34 }
  0x8f   :  { %v312_v37 = vpop.f32.mrf.mxu2 }
  0x90   :  { %v313_v38 = vadd.f32 %v312_v37, %v293_v36  ;;  %v332_v39 = vpop.f32.mrf.mxu3 }
  0x91   :  { %v352_v40 = vpop.f32.mrf.mxu0 }
  0x92   :  { %v333_v41 = vadd.f32 %v332_v39, %v313_v38  ;;  %v372_v42 = vpop.f32.mrf.mxu1 }
  0x94   :  { %v353_v43 = vadd.f32 %v352_v40, %v333_v41 }
  0x96   :  { %v373_v44 = vadd.f32 %v372_v42, %v353_v43 }
  0x97   :  { %v392_v45 = vpop.f32.mrf.mxu2 }
  0x98   :  { %v393_v46 = vadd.f32 %v392_v45, %v373_v44  ;;  %v412_v47 = vpop.f32.mrf.mxu3 }
  0x99   :  { %v432_v48 = vpop.f32.mrf.mxu0 }
  0x9a   :  { %v413_v49 = vadd.f32 %v412_v47, %v393_v46  ;;  %v452_v50 = vpop.f32.mrf.mxu1 }
  0x9c   :  { %v433_v51 = vadd.f32 %v432_v48, %v413_v49 }
  0x9e   :  { %v453_v52 = vadd.f32 %v452_v50, %v433_v51 }
  0x9f   :  { %v472_v53 = vpop.f32.mrf.mxu2 }
  0xa0   :  { %v473_v54 = vadd.f32 %v472_v53, %v453_v52  ;;  %v492_v55 = vpop.f32.mrf.mxu3 }
  0xa1   :  { %v512_v56 = vpop.f32.mrf.mxu0 }
  0xa2   :  { %v493_v57 = vadd.f32 %v492_v55, %v473_v54  ;;  %v532_v58 = vpop.f32.mrf.mxu1 }
  0xa4   :  { %v513_v59 = vadd.f32 %v512_v56, %v493_v57 }
  0xa6   :  { %v533_v60 = vadd.f32 %v532_v58, %v513_v59 }
  0xa7   :  { %v552_v61 = vpop.f32.mrf.mxu2 }
  0xa8   :  { %v553_v62 = vadd.f32 %v552_v61, %v533_v60  ;;  %v572_v63 = vpop.f32.mrf.mxu3 }
  0xaa   :  { %v573_v1 = vadd.f32 %v572_v63, %v553_v62 }
  0xac   :  { %v592_v0 = vpop.f32.mrf.mxu0 }
  0xad   :  { %v612_v2 = vpop.f32.mrf.mxu1  ;;  %v593_v3 = vadd.f32 %v592_v0, %v573_v1 }
  0xaf   :  { %v613_v4 = vadd.f32 %v612_v2, %v593_v3 }
  0xb2   :  { %v632_v5 = vpop.f32.mrf.mxu2 }
  0xb3   :  { %v633_v6 = vadd.f32 %v632_v5, %v613_v4  ;;  %v652_v7 = vpop.f32.mrf.mxu3 }
  0xb4   :  { %v672_v8 = vpop.f32.mrf.mxu0 }
  0xb5   :  { %v653_v9 = vadd.f32 %v652_v7, %v633_v6  ;;  %v692_v10 = vpop.f32.mrf.mxu1 }
  0xb7   :  { %v673_v11 = vadd.f32 %v672_v8, %v653_v9 }
  0xb9   :  { %v693_v12 = vadd.f32 %v692_v10, %v673_v11 }
  0xba   :  { %v712_v13 = vpop.f32.mrf.mxu2 }
  0xbb   :  { %v713_v14 = vadd.f32 %v712_v13, %v693_v12  ;;  %v732_v15 = vpop.f32.mrf.mxu3 }
  0xbc   :  { %v752_v16 = vpop.f32.mrf.mxu0 }
  0xbd   :  { %v733_v17 = vadd.f32 %v732_v15, %v713_v14  ;;  %v772_v18 = vpop.f32.mrf.mxu1 }
  0xbf   :  { %v753_v19 = vadd.f32 %v752_v16, %v733_v17 }
  0xc1   :  { %v773_v20 = vadd.f32 %v772_v18, %v753_v19 }
  0xc2   :  { %v792_v21 = vpop.f32.mrf.mxu2 }
  0xc3   :  { %v793_v22 = vadd.f32 %v792_v21, %v773_v20  ;;  %v812_v23 = vpop.f32.mrf.mxu3 }
  0xc4   :  { %v832_v24 = vpop.f32.mrf.mxu0 }
  0xc5   :  { %v813_v25 = vadd.f32 %v812_v23, %v793_v22  ;;  %v852_v26 = vpop.f32.mrf.mxu1 }
  0xc7   :  { %v833_v27 = vadd.f32 %v832_v24, %v813_v25 }
  0xc9   :  { %v853_v28 = vadd.f32 %v852_v26, %v833_v27 }
  0xca   :  { %v872_v29 = vpop.f32.mrf.mxu2 }
  0xcb   :  { %v873_v30 = vadd.f32 %v872_v29, %v853_v28  ;;  %v892_v31 = vpop.f32.mrf.mxu3 }
  0xcc   :  { %v912_v32 = vpop.f32.mrf.mxu0 }
  0xcd   :  { %v893_v33 = vadd.f32 %v892_v31, %v873_v30  ;;  %v932_v34 = vpop.f32.mrf.mxu1 }
  0xcf   :  { %v913_v35 = vadd.f32 %v912_v32, %v893_v33 }
  0xd1   :  { %v933_v36 = vadd.f32 %v932_v34, %v913_v35 }
  0xd2   :  { %v952_v37 = vpop.f32.mrf.mxu2 }
  0xd3   :  { %v953_v38 = vadd.f32 %v952_v37, %v933_v36  ;;  %v972_v39 = vpop.f32.mrf.mxu3 }
  0xd4   :  { %v992_v40 = vpop.f32.mrf.mxu0 }
  0xd5   :  { %v973_v41 = vadd.f32 %v972_v39, %v953_v38  ;;  %v1012_v42 = vpop.f32.mrf.mxu1 }
  0xd7   :  { %v993_v43 = vadd.f32 %v992_v40, %v973_v41 }
  0xd9   :  { %v1013_v44 = vadd.f32 %v1012_v42, %v993_v43 }
  0xda   :  { %v1032_v45 = vpop.f32.mrf.mxu2 }
  0xdb   :  { %v1033_v46 = vadd.f32 %v1032_v45, %v1013_v44  ;;  %v1052_v47 = vpop.f32.mrf.mxu3 }
  0xdc   :  { %v1072_v48 = vpop.f32.mrf.mxu0 }
  0xdd   :  { %v1053_v49 = vadd.f32 %v1052_v47, %v1033_v46  ;;  %v1092_v50 = vpop.f32.mrf.mxu1 }
  0xdf   :  { %v1073_v51 = vadd.f32 %v1072_v48, %v1053_v49 }
  0xe1   :  { %v1093_v52 = vadd.f32 %v1092_v50, %v1073_v51 }
  0xe2   :  { %v1112_v53 = vpop.f32.mrf.mxu2 }
  0xe3   :  { %v1113_v54 = vadd.f32 %v1112_v53, %v1093_v52  ;;  %v1132_v55 = vpop.f32.mrf.mxu3 }
  0xe4   :  { %v1152_v56 = vpop.f32.mrf.mxu0 }
  0xe5   :  { %v1133_v57 = vadd.f32 %v1132_v55, %v1113_v54  ;;  %v1172_v58 = vpop.f32.mrf.mxu1 }
  0xe7   :  { %v1153_v59 = vadd.f32 %v1152_v56, %v1133_v57 }
  0xe9   :  { %v1173_v60 = vadd.f32 %v1172_v58, %v1153_v59 }
  0xea   :  { %v1192_v61 = vpop.f32.mrf.mxu2 }
  0xeb   :  { %v1193_v62 = vadd.f32 %v1192_v61, %v1173_v60  ;;  %v1212_v63 = vpop.f32.mrf.mxu3 }
  0xec   :  { %v1232_v0 = vpop.f32.mrf.mxu0 }
  0xed   :  { %v1213_v1 = vadd.f32 %v1212_v63, %v1193_v62 }
  0xef   :  { %v1233_v2 = vadd.f32 %v1232_v0, %v1213_v1 }
  0xf1   :  { %1236 = vst.msk [vmem:[#allocation2] sm:$0x3] %vm1235_vm0, %v1233_v2 }
  0xf2   :  { %1247 = dma.vmem_to_hbm [thread:$0]  %s1243_s2, 32, %s1245_s20, [#allocation3]  }
  0xf3   :  { %1279 = dma.done.wait [#allocation3], 32  }
  0xf4   :  { %1280 = vsyncadd [#allocation3], 4294967264 }
  0xf5   :  { %1252 = vsyncpa [#allocation3], 1 }

</bundles_post_ra>
